<compile_context>
chip_gen: v6e
topology: v6e:2x2x1
jax: 0.10.0
libtpu: 0.0.40
codegen_flags: <defaults>
</compile_context>

<pallas_src>
import math

import jax
import jax.numpy as jnp
from jax.experimental import pallas as pl
from jax.experimental.pallas import tpu as pltpu


# ----------------------------------------------------------------------------- helpers
def bilinear_matrix(in_size: int, out_size: int) -> jnp.ndarray:
    """Interpolation matrix (out_size, in_size) reproducing PyTorch
    F.interpolate(..., mode='bilinear', align_corners=False) along one axis."""
    scale = in_size / out_size
    i = jnp.arange(out_size, dtype=jnp.float32)
    src = (i + 0.5) * scale - 0.5
    src = jnp.maximum(src, 0.0)                      # PyTorch clamps negative src to 0
    i0 = jnp.floor(src).astype(jnp.int32)
    i0 = jnp.minimum(i0, in_size - 1)
    i1 = jnp.minimum(i0 + 1, in_size - 1)
    lam = src - i0.astype(jnp.float32)
    w = jnp.zeros((out_size, in_size), jnp.float32)
    rows = jnp.arange(out_size)
    w = w.at[rows, i0].add(1.0 - lam)
    w = w.at[rows, i1].add(lam)
    return w


# ----------------------------------------------------------------------------- kernel
def upsample_conv_kernel(x_ref, m_ref, wwt_ref, b_ref, o_ref):
    # x_ref  : (C*H, W)          one batch element, rows = (c, h), lanes = w
    # m_ref  : (Cout*Ho, C*H)    kron(conv_w, wh): fused 1x1-conv + H-axis bilinear interp
    # wwt_ref: (W, Wo)           W-axis bilinear interp (transposed)
    # b_ref  : (Cout*Ho, 1)      conv bias, repeated per output row (o major, p minor)
    # o_ref  : (Cout*Ho, Wo)     rows = (o, p), lanes = q
    t = jnp.dot(m_ref[...], x_ref[...], preferred_element_type=jnp.float32)   # (Cout*Ho, W)
    y = jnp.dot(t, wwt_ref[...], preferred_element_type=jnp.float32)          # (Cout*Ho, Wo)
    o_ref[...] = (y + b_ref[...]).astype(o_ref.dtype)


# ----------------------------------------------------------------------------- wrapper
def upsample_ratio_1_4(x, ratio, conv_w, conv_b):
    """x: (N, C, H, W) float32 (NCHW, like PyTorch).  Returns (N, C//4, Ho, Wo)."""
    N, C, H, W = x.shape
    Ho, Wo = int(H * ratio), int(W * ratio)          # int() truncation matches the module
    Cout = conv_w.shape[0]

    # Precomputed small operators (f32 for exactness).
    wh = bilinear_matrix(H, Ho)                      # (Ho, H)
    ww = bilinear_matrix(W, Wo)                      # (Wo, W)
    m = jnp.kron(conv_w, wh)                         # (Cout*Ho, C*H): m[(o,p),(c,h)] = Wc[o,c]*wh[p,h]
    wwt = ww.T                                       # (W, Wo)
    bcol = jnp.repeat(conv_b, Ho)[:, None]           # (Cout*Ho, 1)

    x_r = x.reshape(N, C * H, W)                     # free metadata reshape (rows = (c,h))

    out3d = pl.pallas_call(
        upsample_conv_kernel,
        out_shape=jax.ShapeDtypeStruct((N, Cout * Ho, Wo), x.dtype),
        grid=(N,),
        in_specs=[
            pl.BlockSpec((None, C * H, W), lambda n: (n, 0, 0)),
            pl.BlockSpec((Cout * Ho, C * H), lambda n: (0, 0)),   # constant: fetched once
            pl.BlockSpec((W, Wo), lambda n: (0, 0)),              # constant: fetched once
            pl.BlockSpec((Cout * Ho, 1), lambda n: (0, 0)),       # constant: fetched once
        ],
        out_specs=pl.BlockSpec((None, Cout * Ho, Wo), lambda n: (n, 0, 0)),
        compiler_params=pltpu.CompilerParams(dimension_semantics=("parallel",)),
    )(x_r, m, wwt, bcol)

    # TODO(synk): at production WSDformer sizes (large C / H / W) the fused kron(Wc, wh) operator
    # grows as Cout*Ho*C*H; there, tile the grid over output-channel/row blocks and keep the conv
    # and H-interp as separate in-kernel matmuls instead of a single fused constant.
    return out3d.reshape(N, Cout, Ho, Wo)            # free metadata reshape (rows are (o,p))


# ----------------------------------------------------------------------------- main
if __name__ == "__main__":
    features = 8          # C  -> Conv_0 maps to features // 4 = 2 channels
    ratio = 2.0           # spatial upsampling ratio
    N, H, W = 2, 16, 16

    key = jax.random.PRNGKey(0)
    kx, kw, kb = jax.random.split(key, 3)

    x = jax.random.normal(kx, (N, features, H, W), jnp.float32)

    # Deterministic Conv2d(1x1) parameter init (PyTorch-style uniform bounds).
    fan_in = features
    bound = 1.0 / math.sqrt(fan_in)
    conv_w = jax.random.uniform(kw, (features // 4, features), jnp.float32, -bound, bound)
    conv_b = jax.random.uniform(kb, (features // 4,), jnp.float32, -bound, bound)

    out = upsample_ratio_1_4(x, ratio, conv_w, conv_b)
    out = jax.block_until_ready(out)

    # Pure-JAX reference in the original op order (interpolate, then conv + bias).
    Ho, Wo = int(H * ratio), int(W * ratio)
    wh = bilinear_matrix(H, Ho)
    ww = bilinear_matrix(W, Wo)
    ref = jnp.einsum("nchw,ph,qw->ncpq", x, wh, ww)
    ref = jnp.einsum("oc,ncpq->nopq", conv_w, ref) + conv_b[None, :, None, None]

    assert out.shape == (N, features // 4, Ho, Wo)
    err = float(jnp.max(jnp.abs(out - ref)))
    assert err < 5e-4, f"max abs error {err}"

    print("KERNEL_OK")
</pallas_src>

<mosaic_0001>
module attributes {stable_mosaic.version = 11 : i64} {
  func.func @upsample_conv_kernel(%arg0: i32, %arg1: memref<1x128x16xf32, #tpu.memory_space<vmem>>, %arg2: memref<64x128xf32, #tpu.memory_space<vmem>>, %arg3: memref<16x32xf32, #tpu.memory_space<vmem>>, %arg4: memref<64x1xf32, #tpu.memory_space<vmem>>, %arg5: memref<1x64x32xf32, #tpu.memory_space<vmem>>) attributes {dimension_semantics = [#tpu.dimension_semantics<parallel>], iteration_bounds = array<i64: 2>, scalar_prefetch = 0 : i64, scratch_operands = 0 : i64, tpu.core_type = #tpu.core_type<tc>, window_params = [{transform_indices = @transform_0, window_bounds = array<i64: 1, 128, 16>}, {pipeline_mode = #tpu.pipeline_mode<synchronous>, transform_indices = @transform_1, window_bounds = array<i64: 64, 128>}, {pipeline_mode = #tpu.pipeline_mode<synchronous>, transform_indices = @transform_2, window_bounds = array<i64: 16, 32>}, {pipeline_mode = #tpu.pipeline_mode<synchronous>, transform_indices = @transform_3, window_bounds = array<i64: 64, 1>}, {transform_indices = @transform_4, window_bounds = array<i64: 1, 64, 32>}]} {
    %c0 = arith.constant 0 : index
    %c0_0 = arith.constant 0 : index
    %0 = vector.load %arg2[%c0, %c0_0] : memref<64x128xf32, #tpu.memory_space<vmem>>, vector<64x128xf32>
    %c0_1 = arith.constant 0 : index
    %c0_2 = arith.constant 0 : index
    %c0_3 = arith.constant 0 : index
    %1 = vector.load %arg1[%c0_1, %c0_2, %c0_3] : memref<1x128x16xf32, #tpu.memory_space<vmem>>, vector<1x128x16xf32>
    %2 = vector.shape_cast %1 : vector<1x128x16xf32> to vector<128x16xf32>
    %cst = arith.constant dense<0.000000e+00> : vector<64x16xf32>
    %3 = tpu.matmul %0, %2, %cst {dimension_numbers = #tpu.dot_dimension_numbers<[1], [0], [0], [1], [0, 0, 1, 1], [], []>} : vector<64x128xf32>, vector<128x16xf32>, vector<64x16xf32> -> vector<64x16xf32>
    %c0_4 = arith.constant 0 : index
    %c0_5 = arith.constant 0 : index
    %4 = vector.load %arg3[%c0_4, %c0_5] : memref<16x32xf32, #tpu.memory_space<vmem>>, vector<16x32xf32>
    %cst_6 = arith.constant dense<0.000000e+00> : vector<64x32xf32>
    %5 = tpu.matmul %3, %4, %cst_6 {dimension_numbers = #tpu.dot_dimension_numbers<[1], [0], [0], [1], [0, 0, 1, 1], [], []>} : vector<64x16xf32>, vector<16x32xf32>, vector<64x32xf32> -> vector<64x32xf32>
    %c0_7 = arith.constant 0 : index
    %c0_8 = arith.constant 0 : index
    %6 = vector.load %arg4[%c0_7, %c0_8] : memref<64x1xf32, #tpu.memory_space<vmem>>, vector<64x1xf32>
    %7 = vector.broadcast %6 : vector<64x1xf32> to vector<64x32xf32>
    %8 = arith.addf %5, %7 : vector<64x32xf32>
    %c0_9 = arith.constant 0 : index
    %c0_10 = arith.constant 0 : index
    %c0_11 = arith.constant 0 : index
    %9 = vector.load %arg5[%c0_9, %c0_10, %c0_11] : memref<1x64x32xf32, #tpu.memory_space<vmem>>, vector<1x64x32xf32>
    %10 = vector.shape_cast %9 : vector<1x64x32xf32> to vector<64x32xf32>
    %11 = vector.shape_cast %8 : vector<64x32xf32> to vector<1x64x32xf32>
    tpu.vector_store %arg5[%c0_9, %c0_10, %c0_11], %11 {strides = array<i32>} : memref<1x64x32xf32, #tpu.memory_space<vmem>>, vector<1x64x32xf32>,
    return
  }
  func.func @transform_0(%arg0: i32) -> (i32, i32, i32) {
    %c0_i32 = arith.constant 0 : i32
    %c0_i32_0 = arith.constant 0 : i32
    %c0_i32_1 = arith.constant 0 : i32
    return %arg0, %c0_i32, %c0_i32_0 : i32, i32, i32
  }
  func.func @transform_1(%arg0: i32) -> (i32, i32) {
    %c0_i32 = arith.constant 0 : i32
    %c0_i32_0 = arith.constant 0 : i32
    %c0_i32_1 = arith.constant 0 : i32
    return %c0_i32, %c0_i32_0 : i32, i32
  }
  func.func @transform_2(%arg0: i32) -> (i32, i32) {
    %c0_i32 = arith.constant 0 : i32
    %c0_i32_0 = arith.constant 0 : i32
    %c0_i32_1 = arith.constant 0 : i32
    return %c0_i32, %c0_i32_0 : i32, i32
  }
  func.func @transform_3(%arg0: i32) -> (i32, i32) {
    %c0_i32 = arith.constant 0 : i32
    %c0_i32_0 = arith.constant 0 : i32
    %c0_i32_1 = arith.constant 0 : i32
    return %c0_i32, %c0_i32_0 : i32, i32
  }
  func.func @transform_4(%arg0: i32) -> (i32, i32, i32) {
    %c0_i32 = arith.constant 0 : i32
    %c0_i32_0 = arith.constant 0 : i32
    %c0_i32_1 = arith.constant 0 : i32
    return %arg0, %c0_i32, %c0_i32_0 : i32, i32, i32
  }
}

</mosaic_0001>

<bundles_post_ra>
// kernel: tpu_custom_call.1
= control target key start
LH: loop header
LB: loop body
LE: loop exit
PB: predicated region body
PF: predicated region fallthrough
CT: control target
= control target key end

     0   :  { %s731_s15 = smov 0   ;;  %s832_s0 = inlined_call_operand.vmem [shape: f32[2,128,16], index: 0, kind: input, shape index: {}]   ;;  %s833_s1 = inlined_call_operand.vmem [shape: f32[64,128], index: 1, kind: input, shape index: {}]   ;;  %s834_s2 = inlined_call_operand.vmem [shape: f32[16,32], index: 2, kind: input, shape index: {}]   ;;  %s835_s3 = inlined_call_operand.vmem [shape: f32[64,1], index: 3, kind: input, shape index: {}]   ;;  %s836_s4 = inlined_call_operand.vmem [shape: f32[2,64,32], index: 4, kind: output, shape index: {}]  }
   0x1 LB: > { %s571_s16 = sadd.s32 4294967295, %s703_s15   ;;  %p575_p0 = scmp.ge.s32.totalorder %s703_s15, 1  ;;  %s703_s15 = sphi %s731_s15, %s14_s15  }
   0x2   : > { %p162_p1 = scmp.lt.s32.totalorder %s703_s15, 3 }
   0x4   : > { %p163_p2 = pnand %p575_p0, %p162_p1 }
   0x5   : > { %p188_p3 = scmp.lt.s32.totalorder (!%p163_p2), %s571_s16, 1 }
   0x6   : > { %166 = sbr.rel (%p163_p2) target bundleno = 453 (0x1c5), region = 36 }
   0xb   : > { %v198_v0 = vld [vmem:[%s833_s1] sm:$0xff]  ;;  %s838_s16 = smov (!%p188_p3, %s571_s16), 1  ;;  %v199_v17 = vld [vmem:[%s833_s1 + $0x8] sm:$0xff]  ;;  %v200_v18 = vld [vmem:[%s833_s1 + $0x10] sm:$0xff]  ;;  %v705_v28 = vmov 0   ;;  %vm377_vm0 = vcmask 130048  }
   0xc   : > { %658 = vmatprep.mubr.f32.mxu0 %v198_v0  ;;  %s590_s19 = sshll.u32 %s838_s16, 7  ;;  %v201_v19 = vld [vmem:[%s833_s1 + $0x18] sm:$0xff]  ;;  %v202_v20 = vld [vmem:[%s833_s1 + $0x20] sm:$0xff]  ;;  %v203_v21 = vld [vmem:[%s833_s1 + $0x28] sm:$0xff]  ;;  %696 = vset.pattern.permute.xlu1 %v705_v28  ;;  %s591_s7 = sshll.u32 %s838_s16, 6  ;;  %vm507_vm1 = vcmask 261120  }
   0xd   : > { %s748_s22 = scalar_lea.vmem %s832_s0, %s590_s19  ;;  %v204_v22 = vld [vmem:[%s833_s1 + $0x30] sm:$0xff]  ;;  %v205_v23 = vld [vmem:[%s833_s1 + $0x38] sm:$0xff]  ;;  %v328_v24 = vld [vmem:[%s834_s2 + $0x8] sm:$0xff]  ;;  %695 = vset.pattern.permute.xlu0 %v705_v28  ;;  %s197_s10 = scalar_lea.vmem %s836_s4, %s591_s7 }
   0xe   : > { %v221_v1 = vld [vmem:[%s748_s22 + $0x78] sm:$0xff]  ;;  %v220_v2 = vld [vmem:[%s748_s22 + $0x70] sm:$0xff]  ;;  %v219_v3 = vld [vmem:[%s748_s22 + $0x68] sm:$0xff]  ;;  %670 = vmatprep.subr.mxu1 %v328_v24 }
   0xf   : > { %626 = vmatprep.subr.mxu0 %v221_v1  ;;  %v218_v4 = vld [vmem:[%s748_s22 + $0x60] sm:$0xff]  ;;  %v217_v5 = vld [vmem:[%s748_s22 + $0x58] sm:$0xff]  ;;  %v216_v6 = vld [vmem:[%s748_s22 + $0x50] sm:$0xff]  ;;  %671 = vmatpush3.msra.mxu1 %v328_v24 }
  0x10   : > { %627 = vmatpush3.msra.mxu0 %v221_v1  ;;  %v215_v7 = vld [vmem:[%s748_s22 + $0x48] sm:$0xff]  ;;  %v214_v8 = vld [vmem:[%s748_s22 + $0x40] sm:$0xff]  ;;  %v213_v9 = vld [vmem:[%s748_s22 + $0x38] sm:$0xff] }
  0x11   : > { %628 = vmatprep.subr.mxu0 %v220_v2  ;;  %v212_v10 = vld [vmem:[%s748_s22 + $0x30] sm:$0xff]  ;;  %v211_v11 = vld [vmem:[%s748_s22 + $0x28] sm:$0xff]  ;;  %v210_v12 = vld [vmem:[%s748_s22 + $0x20] sm:$0xff] }
  0x12   : > { %629 = vmatpush3.msra.mxu0 %v220_v2  ;;  %v209_v13 = vld [vmem:[%s748_s22 + $0x18] sm:$0xff]  ;;  %v208_v14 = vld [vmem:[%s748_s22 + $0x10] sm:$0xff]  ;;  %v207_v15 = vld [vmem:[%s748_s22 + $0x8] sm:$0xff] }
  0x13   : > { %630 = vmatprep.subr.mxu0 %v219_v3  ;;  %v206_v16 = vld [vmem:[%s748_s22] sm:$0xff]  ;;  %v331_v26 = vld [vmem:[%s835_s3 + $0x10] sm:$0xff]  ;;  %v332_v29 = vld [vmem:[%s835_s3 + $0x18] sm:$0xff] }
  0x14   : > { %631 = vmatpush3.msra.mxu0 %v219_v3  ;;  %v327_v25 = vld [vmem:[%s834_s2] sm:$0xff]  ;;  %349 = vperm.xlu1 %696, %v331_v26   ;;  %v330_v30 = vld [vmem:[%s835_s3 + $0x8] sm:$0xff]  ;;  %v336_v33 = vld [vmem:[%s835_s3 + $0x38] sm:$0xff] }
  0x15   : > { %632 = vmatprep.subr.mxu0 %v218_v4  ;;  %672 = vmatprep.subr.mxu1 %v327_v25  ;;  %v329_v27 = vld [vmem:[%s835_s3] sm:$0xff]  ;;  %v334_v31 = vld [vmem:[%s835_s3 + $0x28] sm:$0xff]  ;;  %v335_v34 = vld [vmem:[%s835_s3 + $0x30] sm:$0xff] }
  0x16   : > { %633 = vmatpush3.msra.mxu0 %v218_v4  ;;  %673 = vmatpush3.msra.mxu1 %v327_v25  ;;  %v333_v32 = vld [vmem:[%s835_s3 + $0x20] sm:$0xff] }
  0x17   : > { %634 = vmatprep.subr.mxu0 %v217_v5  ;;  %339 = vperm.xlu0 %695, %v329_v27  }
  0x18   : > { %635 = vmatpush3.msra.mxu0 %v217_v5  ;;  %354 = vperm.xlu1 %696, %v332_v29  }
  0x19   : > { %636 = vmatprep.subr.mxu0 %v216_v6 }
  0x1a   : > { %637 = vmatpush3.msra.mxu0 %v216_v6 }
  0x1b   : > { %638 = vmatprep.subr.mxu0 %v215_v7  ;;  %344 = vperm.xlu0 %695, %v330_v30  }
  0x1c   : > { %639 = vmatpush3.msra.mxu0 %v215_v7  ;;  %364 = vperm.xlu1 %696, %v334_v31  }
  0x1d   : > { %640 = vmatprep.subr.mxu0 %v214_v8 }
  0x1e   : > { %641 = vmatpush3.msra.mxu0 %v214_v8 }
  0x1f   : > { %642 = vmatprep.subr.mxu0 %v213_v9  ;;  %359 = vperm.xlu0 %695, %v333_v32  }
  0x20   : > { %643 = vmatpush3.msra.mxu0 %v213_v9  ;;  %374 = vperm.xlu1 %696, %v336_v33  }
  0x21   : > { %644 = vmatprep.subr.mxu0 %v212_v10 }
  0x22   : > { %645 = vmatpush3.msra.mxu0 %v212_v10 }
  0x23   : > { %646 = vmatprep.subr.mxu0 %v211_v11  ;;  %369 = vperm.xlu0 %695, %v335_v34  }
  0x24   : > { %647 = vmatpush3.msra.mxu0 %v211_v11 }
  0x25   : > { %648 = vmatprep.subr.mxu0 %v210_v12 }
  0x26   : > { %649 = vmatpush3.msra.mxu0 %v210_v12 }
  0x27   : > { %650 = vmatprep.subr.mxu0 %v209_v13 }
  0x28   : > { %651 = vmatpush3.msra.mxu0 %v209_v13 }
  0x29   : > { %652 = vmatprep.subr.mxu0 %v208_v14 }
  0x2a   : > { %653 = vmatpush3.msra.mxu0 %v208_v14 }
  0x2b   : > { %654 = vmatprep.subr.mxu0 %v207_v15 }
  0x2c   : > { %655 = vmatpush3.msra.mxu0 %v207_v15 }
  0x2d   : > { %656 = vmatprep.subr.mxu0 %v206_v16 }
  0x2e   : > { %657 = vmatpush3.msra.mxu0 %v206_v16 }
  0x2f   : > { %659 = vmatmul.mubr.f32.vlgmr.msra.gmra.mxu0 %v199_v17 }
  0x30   : > { %661 = vmatprep.mubr.f32.mxu0 %v200_v18 }
  0x33   : > { %662 = vmatmul.mubr.f32.gmra.mxu0 %v201_v19 }
  0x34   : > { %664 = vmatprep.mubr.f32.mxu0 %v202_v20 }
  0x37   : > { %665 = vmatmul.mubr.f32.gmra.mxu0 %v203_v21 }
  0x38   : > { %667 = vmatprep.mubr.f32.mxu0 %v204_v22 }
  0x3b   : > { %668 = vmatmul.mubr.f32.gmra.mxu0 %v205_v23 }
  0x8f   : > { %v350_v43 = vpop.permute.xlu1 %349 }
  0x92   : > { %v340_v44 = vpop.permute.xlu0 %339 }
  0x93   : > { %v355_v45 = vpop.permute.xlu1 %354 }
  0x96   : > { %v345_v46 = vpop.permute.xlu0 %344 }
  0x97   : > { %v365_v53 = vpop.permute.xlu1 %364 }
  0x9a   : > { %v360_v56 = vpop.permute.xlu0 %359 }
  0x9b   : > { %v375_v61 = vpop.permute.xlu1 %374 }
  0x9e   : > { %v370_v0 = vpop.permute.xlu0 %369 }
  0xef   : > { %v660_v35 = vpop.f32.mrf.mxu0 }
  0xf1   : > { %v288_v36 = vpop.f32.mrf.mxu0 }
  0xf2   : > { %674 = vmatprep.mubr.msk.f32.mxu1 %vm377_vm0, %v288_v36 }
  0xf3   : > { %v663_v37 = vpop.f32.mrf.mxu0  ;;  %675 = vmatmul.mubr.msk.f32.vlgmr.msra.gmra.mxu1 %vm377_vm0, %v660_v35 }
  0xf5   : > { %v298_v38 = vpop.f32.mrf.mxu0 }
  0xf6   : > { %677 = vmatprep.mubr.msk.f32.mxu1 %vm377_vm0, %v298_v38 }
  0xf7   : > { %v666_v39 = vpop.f32.mrf.mxu0  ;;  %678 = vmatmul.mubr.msk.f32.gmra.mxu1 %vm377_vm0, %v663_v37 }
  0xf9   : > { %v308_v40 = vpop.f32.mrf.mxu0 }
  0xfa   : > { %680 = vmatprep.mubr.msk.f32.mxu1 %vm377_vm0, %v308_v40 }
  0xfb   : > { %v669_v41 = vpop.f32.mrf.mxu0  ;;  %681 = vmatmul.mubr.msk.f32.gmra.mxu1 %vm377_vm0, %v666_v39 }
  0xfd   : > { %v318_v42 = vpop.f32.mrf.mxu0 }
  0xfe   : > { %683 = vmatprep.mubr.msk.f32.mxu1 %vm377_vm0, %v318_v42 }
  0xff   : > { %684 = vmatmul.mubr.msk.f32.gmra.mxu1 %vm377_vm0, %v669_v41 }
 0x1b3   : > { %v676_v47 = vpop.f32.mrf.mxu1 }
 0x1b4   : > { %v474_v48 = vadd.f32 %v676_v47, %v345_v46 }
 0x1b5   : > { %v468_v49 = vpop.f32.mrf.mxu1 }
 0x1b6   : > { %509 = vst.msk [vmem:[%s197_s10 + $0x8] sm:$0xff] %vm507_vm1, %v474_v48  ;;  %v469_v50 = vadd.f32 %v468_v49, %v340_v44 }
 0x1b7   : > { %v679_v51 = vpop.f32.mrf.mxu1 }
 0x1b8   : > { %508 = vst.msk [vmem:[%s197_s10] sm:$0xff] %vm507_vm1, %v469_v50  ;;  %v484_v52 = vadd.f32 %v679_v51, %v355_v45 }
 0x1b9   : > { %v478_v54 = vpop.f32.mrf.mxu1 }
 0x1ba   : > { %511 = vst.msk [vmem:[%s197_s10 + $0x18] sm:$0xff] %vm507_vm1, %v484_v52  ;;  %v479_v55 = vadd.f32 %v478_v54, %v350_v43 }
 0x1bb   : > { %v682_v57 = vpop.f32.mrf.mxu1 }
 0x1bc   : > { %510 = vst.msk [vmem:[%s197_s10 + $0x10] sm:$0xff] %vm507_vm1, %v479_v55  ;;  %v494_v58 = vadd.f32 %v682_v57, %v365_v53 }
 0x1bd   : > { %v488_v59 = vpop.f32.mrf.mxu1 }
 0x1be   : > { %513 = vst.msk [vmem:[%s197_s10 + $0x28] sm:$0xff] %vm507_vm1, %v494_v58  ;;  %v489_v60 = vadd.f32 %v488_v59, %v360_v56 }
 0x1bf   : > { %v685_v62 = vpop.f32.mrf.mxu1 }
 0x1c0   : > { %512 = vst.msk [vmem:[%s197_s10 + $0x20] sm:$0xff] %vm507_vm1, %v489_v60  ;;  %v504_v63 = vadd.f32 %v685_v62, %v375_v61 }
 0x1c1   : > { %v498_v1 = vpop.f32.mrf.mxu1 }
 0x1c2   : > { %515 = vst.msk [vmem:[%s197_s10 + $0x38] sm:$0xff] %vm507_vm1, %v504_v63  ;;  %v499_v2 = vadd.f32 %v498_v1, %v370_v0 }
 0x1c4   : > { %514 = vst.msk [vmem:[%s197_s10 + $0x30] sm:$0xff] %vm507_vm1, %v499_v2 }
 0x1c5 PF: > { %s14_s15 = sadd.s32 1, %s703_s15  }
 0x1c6   : > { %p11_p4 = scmp.ge.s32.totalorder %s14_s15, 4  }
 0x1c8   :  { %13 = sbr.rel (!%p11_p4) target bundleno = 1 (0x1), region = 66 }

</bundles_post_ra>
